<compile_context>
chip_gen: v6e
topology: v6e:2x2x1
jax: 0.10.0
libtpu: 0.0.40
codegen_flags: <defaults>
</compile_context>

<pallas_src>
import functools
import math

import jax
import jax.numpy as jnp
from jax.experimental import pallas as pl
from jax.experimental.pallas import tpu as pltpu

# Same (highest) f32 matmul precision inside kernels and in the pure-JAX
# reference so the numerical comparison is tight.
jax.config.update("jax_default_matmul_precision", "highest")
_PREC = jax.lax.Precision.HIGHEST
_LN_EPS = 1e-5


# ----------------------------------------------------------------------------
# Tiling / spec helpers
# ----------------------------------------------------------------------------
def _row_tiling(m, max_tile=256):
    """Pick a dense row tile; pad awkward M instead of tiny/giant fallbacks.

    Returns (tile, padded_rows)."""
    if m <= max_tile:
        return m, m
    for t in range(max_tile, 7, -8):
        if m % t == 0:
            return t, m
    pm = ((m + max_tile - 1) // max_tile) * max_tile
    return max_tile, pm


def _col_tiling(n, max_tile=512):
    """Tile for the d_ffn axis (keeps W1/W2 VMEM bounded on v7x)."""
    if n <= max_tile:
        return n
    for t in range(max_tile, 127, -128):
        if n % t == 0:
            return t
    return n


def _pad_rows(x, padded_rows):
    m = x.shape[0]
    if padded_rows == m:
        return x
    return jnp.pad(x, ((0, padded_rows - m), (0, 0)))


def _compiler_params(dimension_semantics, block_shapes):
    """vmem_limit sized to ~2x the per-step working set (+4 MiB headroom),
    clamped to [32 MiB, 64 MiB] so it is valid on every generation (v7x has
    only 64 MiB physical VMEM)."""
    total = sum(math.prod(s) for s in block_shapes) * 4
    limit = int(min(max(2 * total + (4 << 20), 32 << 20), 64 << 20))
    return pltpu.CompilerParams(dimension_semantics=dimension_semantics,
                                vmem_limit_bytes=limit)


_BUFFERED_WEIGHTS = None


def _probe_kernel(x_ref, w_ref, o_ref):
    o_ref[...] = x_ref[...] + w_ref[...]


def _buffered_weights_supported():
    """pl.Buffered(1) lets grid-invariant weights be single-buffered (halves
    their VMEM footprint). Probe once; degrade cleanly if unsupported."""
    global _BUFFERED_WEIGHTS
    if _BUFFERED_WEIGHTS is None:
        try:
            out = pl.pallas_call(
                _probe_kernel,
                out_shape=jax.ShapeDtypeStruct((16, 128), jnp.float32),
                grid=(2,),
                in_specs=[
                    pl.BlockSpec((8, 128), lambda i: (i, 0)),
                    pl.BlockSpec((8, 128), lambda i: (0, 0),
                                 pipeline_mode=pl.Buffered(1)),
                ],
                out_specs=pl.BlockSpec((8, 128), lambda i: (i, 0)),
            )(jnp.zeros((16, 128), jnp.float32),
              jnp.zeros((8, 128), jnp.float32))
            jax.block_until_ready(out)
            _BUFFERED_WEIGHTS = True
        except Exception:  # pragma: no cover - older jax without pipeline_mode
            _BUFFERED_WEIGHTS = False
    return _BUFFERED_WEIGHTS


def _const_spec(block_shape):
    """BlockSpec for grid-invariant operands (weights / biases / LN params)."""
    index_map = lambda *_: (0,) * len(block_shape)
    if _buffered_weights_supported():
        return pl.BlockSpec(block_shape, index_map,
                            pipeline_mode=pl.Buffered(1))
    return pl.BlockSpec(block_shape, index_map)


# ----------------------------------------------------------------------------
# Kernel 1: fused Linear  y = x @ W + b   (optionally fused ReLU)
# Used for the fused QKV projection, Q projection and fused KV projection.
# ----------------------------------------------------------------------------
def _linear_kernel(x_ref, w_ref, b_ref, o_ref, *, relu):
    y = jnp.dot(x_ref[...], w_ref[...],
                preferred_element_type=jnp.float32, precision=_PREC)
    y = y + b_ref[...]
    if relu:
        y = jnp.maximum(y, 0.0)
    o_ref[...] = y.astype(o_ref.dtype)


def linear(x, w, b, *, relu=False):
    """x: (M, K), w: (K, N), b: (N,) -> (M, N), all f32."""
    M, K = x.shape
    K2, N = w.shape
    assert K == K2
    TM, PM = _row_tiling(M)
    xp = _pad_rows(x, PM)
    out = pl.pallas_call(
        functools.partial(_linear_kernel, relu=relu),
        out_shape=jax.ShapeDtypeStruct((PM, N), x.dtype),
        grid=(PM // TM,),
        in_specs=[
            pl.BlockSpec((TM, K), lambda i: (i, 0)),
            _const_spec((K, N)),          # weight resident, single-buffered
            _const_spec((1, N)),
        ],
        out_specs=pl.BlockSpec((TM, N), lambda i: (i, 0)),
        compiler_params=_compiler_params(
            ("parallel",), [(TM, K), (K, N), (1, N), (TM, N)]),
    )(xp, w, b.reshape(1, N))
    return out if PM == M else out[:M]


# ----------------------------------------------------------------------------
# Kernel 2: fused  LayerNorm(residual + (x @ Wo + bo))
# (attention output projection + ResidualBlock)
# ----------------------------------------------------------------------------
def _linear_res_ln_kernel(x_ref, w_ref, b_ref, res_ref, g_ref, be_ref, o_ref,
                          *, eps):
    y = jnp.dot(x_ref[...], w_ref[...],
                preferred_element_type=jnp.float32, precision=_PREC)
    y = y + b_ref[...]
    z = res_ref[...] + y                   # dropout is identity at inference
    mu = jnp.mean(z, axis=-1, keepdims=True)
    zc = z - mu
    var = jnp.mean(zc * zc, axis=-1, keepdims=True)
    zn = zc * jax.lax.rsqrt(var + eps)
    o_ref[...] = (zn * g_ref[...] + be_ref[...]).astype(o_ref.dtype)


def linear_residual_layernorm(x, w, b, residual, gamma, beta, *, eps=_LN_EPS):
    M, K = x.shape
    N = w.shape[1]
    TM, PM = _row_tiling(M)
    xp = _pad_rows(x, PM)
    rp = _pad_rows(residual, PM)
    out = pl.pallas_call(
        functools.partial(_linear_res_ln_kernel, eps=eps),
        out_shape=jax.ShapeDtypeStruct((PM, N), x.dtype),
        grid=(PM // TM,),
        in_specs=[
            pl.BlockSpec((TM, K), lambda i: (i, 0)),
            _const_spec((K, N)),
            _const_spec((1, N)),
            pl.BlockSpec((TM, N), lambda i: (i, 0)),
            _const_spec((1, N)),
            _const_spec((1, N)),
        ],
        out_specs=pl.BlockSpec((TM, N), lambda i: (i, 0)),
        compiler_params=_compiler_params(
            ("parallel",),
            [(TM, K), (K, N), (1, N), (TM, N), (1, N), (1, N), (TM, N)]),
    )(xp, w, b.reshape(1, N), rp, gamma.reshape(1, N), beta.reshape(1, N))
    return out if PM == M else out[:M]


# ----------------------------------------------------------------------------
# Kernel 3: fused FFN + residual + LayerNorm, d_ffn axis tiled with an f32
# accumulator so the (TM, d_ffn) hidden activation never touches HBM.
# ----------------------------------------------------------------------------
def _ffn_res_ln_kernel(x_ref, w1_ref, b1_ref, w2_ref, b2_ref, g_ref, be_ref,
                       o_ref, acc_ref, *, eps):
    f = pl.program_id(1)

    @pl.when(f == 0)
    def _():
        acc_ref[...] = jnp.zeros_like(acc_ref)

    h = jnp.dot(x_ref[...], w1_ref[...],
                preferred_element_type=jnp.float32, precision=_PREC)
    h = jnp.maximum(h + b1_ref[...], 0.0)  # dropout is identity at inference
    acc_ref[...] += jnp.dot(h, w2_ref[...],
                            preferred_element_type=jnp.float32, precision=_PREC)

    @pl.when(f == pl.num_programs(1) - 1)
    def _():
        z = x_ref[...] + acc_ref[...] + b2_ref[...]
        mu = jnp.mean(z, axis=-1, keepdims=True)
        zc = z - mu
        var = jnp.mean(zc * zc, axis=-1, keepdims=True)
        zn = zc * jax.lax.rsqrt(var + eps)
        o_ref[...] = (zn * g_ref[...] + be_ref[...]).astype(o_ref.dtype)


def ffn_residual_layernorm(x, w1, b1, w2, b2, gamma, beta, *, eps=_LN_EPS):
    M, D = x.shape
    F = w1.shape[1]
    TM, PM = _row_tiling(M)
    TF = _col_tiling(F)
    xp = _pad_rows(x, PM)
    out = pl.pallas_call(
        functools.partial(_ffn_res_ln_kernel, eps=eps),
        out_shape=jax.ShapeDtypeStruct((PM, D), x.dtype),
        grid=(PM // TM, F // TF),
        in_specs=[
            pl.BlockSpec((TM, D), lambda i, f: (i, 0)),
            pl.BlockSpec((D, TF), lambda i, f: (0, f)),
            pl.BlockSpec((1, TF), lambda i, f: (0, f)),
            pl.BlockSpec((TF, D), lambda i, f: (f, 0)),
            _const_spec((1, D)),
            _const_spec((1, D)),
            _const_spec((1, D)),
        ],
        out_specs=pl.BlockSpec((TM, D), lambda i, f: (i, 0)),
        scratch_shapes=[pltpu.VMEM((TM, D), jnp.float32)],
        compiler_params=_compiler_params(
            ("parallel", "arbitrary"),
            [(TM, D), (D, TF), (1, TF), (TF, D), (1, D), (1, D), (1, D),
             (TM, D), (TM, D)]),
    )(xp, w1, b1.reshape(1, F), w2, b2.reshape(1, D),
      gamma.reshape(1, D), beta.reshape(1, D))
    return out if PM == M else out[:M]


# ----------------------------------------------------------------------------
# Kernel 4: attention core — one grid step per batch element, all heads
# handled in-kernel by slicing the channel axis (no XLA head transposes,
# mask passed once per batch, lane-dense (Sq, H*dh) output store).
# ----------------------------------------------------------------------------
def _mha_core(q, k, v, mask, *, n_heads, dqk, dh, inv_scale):
    """q: (Sq, H*dqk), k: (Sk, H*dqk), v: (Sk, H*dh), mask: (Sq, Sk) or None."""
    outs = []
    for h in range(n_heads):
        qh = q[:, h * dqk:(h + 1) * dqk]
        kh = k[:, h * dqk:(h + 1) * dqk]
        vh = v[:, h * dh:(h + 1) * dh]
        s = jax.lax.dot_general(
            qh, kh, (((1,), (1,)), ((), ())),
            preferred_element_type=jnp.float32, precision=_PREC) * inv_scale
        if mask is not None:
            s = jnp.where(mask, s, jnp.float32(-1e30))
        e = jnp.exp(s - jnp.max(s, axis=-1, keepdims=True))
        if mask is not None:
            # Fully-masked rows -> all-zero weights (matches torch's
            # softmax(-inf row) -> NaN -> nan_to_num(0)).
            e = jnp.where(mask, e, 0.0)
        denom = jnp.sum(e, axis=-1, keepdims=True)
        oh = jnp.dot(e, vh, preferred_element_type=jnp.float32, precision=_PREC)
        outs.append(oh * (1.0 / jnp.maximum(denom, jnp.float32(1e-30))))
    return jnp.concatenate(outs, axis=-1)


def _self_attn_kernel(*refs, n_heads, dqk, dh, inv_scale, has_mask):
    if has_mask:
        qkv_ref, m_ref, o_ref = refs
        mask = m_ref[...] > 0.5
    else:
        qkv_ref, o_ref = refs
        mask = None
    qkv = qkv_ref[...]
    hq = n_heads * dqk
    q = qkv[:, 0:hq]
    k = qkv[:, hq:2 * hq]
    v = qkv[:, 2 * hq:2 * hq + n_heads * dh]
    o_ref[...] = _mha_core(q, k, v, mask, n_heads=n_heads, dqk=dqk, dh=dh,
                           inv_scale=inv_scale).astype(o_ref.dtype)


def _cross_attn_kernel(*refs, n_heads, dqk, dh, inv_scale, has_mask):
    if has_mask:
        q_ref, kv_ref, m_ref, o_ref = refs
        mask = m_ref[...] > 0.5
    else:
        q_ref, kv_ref, o_ref = refs
        mask = None
    kv = kv_ref[...]
    hq = n_heads * dqk
    k = kv[:, 0:hq]
    v = kv[:, hq:hq + n_heads * dh]
    o_ref[...] = _mha_core(q_ref[...], k, v, mask, n_heads=n_heads, dqk=dqk,
                           dh=dh, inv_scale=inv_scale).astype(o_ref.dtype)


def self_attention(qkv, mask, *, n_heads, dqk, dh):
    """qkv: (B, Sq, 3*H*dqk) packed [Q | K | V] -> (B, Sq, H*dh)."""
    B, Sq, W = qkv.shape
    Hv = n_heads * dh
    inv_scale = 1.0 / math.sqrt(float(dqk))
    has_mask = mask is not None
    in_specs = [pl.BlockSpec((None, Sq, W), lambda b: (b, 0, 0))]
    args = [qkv]
    blocks = [(Sq, W), (Sq, Hv)]
    if has_mask:
        Sk = mask.shape[-1]
        in_specs.append(pl.BlockSpec((None, Sq, Sk), lambda b: (b, 0, 0)))
        args.append(mask.astype(jnp.float32))
        blocks.append((Sq, Sk))
    kernel = functools.partial(_self_attn_kernel, n_heads=n_heads, dqk=dqk,
                               dh=dh, inv_scale=inv_scale, has_mask=has_mask)
    return pl.pallas_call(
        kernel,
        out_shape=jax.ShapeDtypeStruct((B, Sq, Hv), qkv.dtype),
        grid=(B,),
        in_specs=in_specs,
        out_specs=pl.BlockSpec((None, Sq, Hv), lambda b: (b, 0, 0)),
        compiler_params=_compiler_params(("parallel",), blocks),
    )(*args)


def cross_attention(q, kv, mask, *, n_heads, dqk, dh):
    """q: (B, Sq, H*dqk), kv: (B, Sk, 2*H*d) packed [K | V] -> (B, Sq, H*dh)."""
    B, Sq, Wq = q.shape
    Sk, Wkv = kv.shape[1], kv.shape[2]
    Hv = n_heads * dh
    inv_scale = 1.0 / math.sqrt(float(dqk))
    has_mask = mask is not None
    in_specs = [pl.BlockSpec((None, Sq, Wq), lambda b: (b, 0, 0)),
                pl.BlockSpec((None, Sk, Wkv), lambda b: (b, 0, 0))]
    args = [q, kv]
    blocks = [(Sq, Wq), (Sk, Wkv), (Sq, Hv)]
    if has_mask:
        in_specs.append(pl.BlockSpec((None, Sq, Sk), lambda b: (b, 0, 0)))
        args.append(mask.astype(jnp.float32))
        blocks.append((Sq, Sk))
    kernel = functools.partial(_cross_attn_kernel, n_heads=n_heads, dqk=dqk,
                               dh=dh, inv_scale=inv_scale, has_mask=has_mask)
    return pl.pallas_call(
        kernel,
        out_shape=jax.ShapeDtypeStruct((B, Sq, Hv), q.dtype),
        grid=(B,),
        in_specs=in_specs,
        out_specs=pl.BlockSpec((None, Sq, Hv), lambda b: (b, 0, 0)),
        compiler_params=_compiler_params(("parallel",), blocks),
    )(*args)


# ----------------------------------------------------------------------------
# Module wrappers (composition / cheap reshapes only; heavy math in kernels)
# ----------------------------------------------------------------------------
def decoder_layer_forward(p, x, enc, self_mask, enc_mask):
    B, S, D = x.shape
    Se = enc.shape[1]
    M = B * S
    x2d = x.reshape(M, D)

    # -- causal self-attention -----------------------------------------------
    sa = p["self_attn"]
    qkv = linear(x2d, sa["wqkv"], sa["bqkv"])                 # (M, 3*H*dqk)
    ctx = self_attention(qkv.reshape(B, S, -1), self_mask,
                         n_heads=sa["n_heads"], dqk=sa["dqk"], dh=sa["dh"])
    x1 = linear_residual_layernorm(ctx.reshape(M, -1), sa["wo"], sa["bo"],
                                   x2d, p["ln1_g"], p["ln1_b"])

    # -- cross-attention -------------------------------------------------------
    ca = p["cross_attn"]
    q = linear(x1, ca["wq"], ca["bq"])                        # (M, H*dqk)
    kv = linear(enc.reshape(B * Se, -1), ca["wkv"], ca["bkv"])  # (B*Se, 2*H*d)
    ctx2 = cross_attention(q.reshape(B, S, -1), kv.reshape(B, Se, -1), enc_mask,
                           n_heads=ca["n_heads"], dqk=ca["dqk"], dh=ca["dh"])
    x2 = linear_residual_layernorm(ctx2.reshape(M, -1), ca["wo"], ca["bo"],
                                   x1, p["ln2_g"], p["ln2_b"])

    # -- FFN -------------------------------------------------------------------
    x3 = ffn_residual_layernorm(x2, p["ffn_w1"], p["ffn_b1"],
                                p["ffn_w2"], p["ffn_b2"],
                                p["ln3_g"], p["ln3_b"])
    return x3.reshape(B, S, D)


def standard_decoder_forward(prepared_params, x, encoder_output,
                             self_attention_mask=None, encoder_mask=None):
    out = x
    for p in prepared_params:
        out = decoder_layer_forward(p, out, encoder_output,
                                    self_attention_mask, encoder_mask)
    return out


def prepare_decoder_params(params):
    """Build the fused weight layouts consumed by the Pallas forward."""
    plans = []
    for p in params:
        sa, ca = p["self_attn"], p["cross_attn"]
        plan = dict(p)
        plan["self_attn"] = dict(
            wqkv=jnp.concatenate([sa["wq"], sa["wk"], sa["wv"]], axis=1),
            bqkv=jnp.concatenate([sa["bq"], sa["bk"], sa["bv"]]),
            wo=sa["wo"], bo=sa["bo"],
            n_heads=sa["n_heads"], dqk=sa["dqk"], dh=sa["dh"])
        plan["cross_attn"] = dict(
            wq=ca["wq"], bq=ca["bq"],
            wkv=jnp.concatenate([ca["wk"], ca["wv"]], axis=1),
            bkv=jnp.concatenate([ca["bk"], ca["bv"]]),
            wo=ca["wo"], bo=ca["bo"],
            n_heads=ca["n_heads"], dqk=ca["dqk"], dh=ca["dh"])
        plans.append(plan)
    return plans


# ----------------------------------------------------------------------------
# Parameter init (nn.Linear-style uniform; LayerNorm gamma~1, beta~0)
# ----------------------------------------------------------------------------
def _init_linear(key, d_in, d_out):
    k1, k2 = jax.random.split(key)
    lim = 1.0 / math.sqrt(d_in)
    w = jax.random.uniform(k1, (d_in, d_out), jnp.float32, -lim, lim)
    b = jax.random.uniform(k2, (d_out,), jnp.float32, -lim, lim)
    return w, b


def init_mha(key, d_out, d_q, d_k, d_v, n_heads):
    dqk = d_out // n_heads
    dh = d_out // n_heads
    keys = jax.random.split(key, 4)
    wq, bq = _init_linear(keys[0], d_q, dqk * n_heads)
    wk, bk = _init_linear(keys[1], d_k, dqk * n_heads)
    wv, bv = _init_linear(keys[2], d_v, dh * n_heads)
    wo, bo = _init_linear(keys[3], dh * n_heads, d_out)
    return dict(wq=wq, bq=bq, wk=wk, bk=bk, wv=wv, bv=bv, wo=wo, bo=bo,
                n_heads=n_heads, dqk=dqk, dh=dh)


def init_decoder_layer(key, d_model, d_ffn, n_heads):
    keys = jax.random.split(key, 8)
    p = dict(
        self_attn=init_mha(keys[0], d_model, d_model, d_model, d_model, n_heads),
        cross_attn=init_mha(keys[1], d_model, d_model, d_model, d_model, n_heads),
    )
    p["ffn_w1"], p["ffn_b1"] = _init_linear(keys[2], d_model, d_ffn)
    p["ffn_w2"], p["ffn_b2"] = _init_linear(keys[3], d_ffn, d_model)
    for i, name in enumerate(("ln1", "ln2", "ln3")):
        kg, kb = jax.random.split(keys[4 + i])
        p[name + "_g"] = 1.0 + 0.1 * jax.random.normal(kg, (d_model,), jnp.float32)
        p[name + "_b"] = 0.1 * jax.random.normal(kb, (d_model,), jnp.float32)
    return p


def init_decoder(key, n_layers, d_model, d_ffn, n_heads):
    return [init_decoder_layer(k, d_model, d_ffn, n_heads)
            for k in jax.random.split(key, n_layers)]


# ----------------------------------------------------------------------------
# Pure-JAX reference (mirrors the PyTorch forward with dropout = identity)
# ----------------------------------------------------------------------------
def _ref_mha(p, in_q, in_k, in_v, mask):
    B, Sq, _ = in_q.shape
    Sk = in_k.shape[1]
    H, dqk, dh = p["n_heads"], p["dqk"], p["dh"]
    q = in_q @ p["wq"] + p["bq"]
    k = in_k @ p["wk"] + p["bk"]
    v = in_v @ p["wv"] + p["bv"]
    q = q.reshape(B, Sq, H, dqk).transpose(0, 2, 1, 3)
    k = k.reshape(B, Sk, H, dqk).transpose(0, 2, 1, 3)
    v = v.reshape(B, Sk, H, dh).transpose(0, 2, 1, 3)
    s = jnp.einsum("bhqd,bhkd->bhqk", q, k, precision=_PREC) / jnp.sqrt(
        jnp.float32(dqk))
    if mask is not None:
        s = jnp.where(mask[:, None, :, :] > 0, s, -jnp.inf)
    w = jax.nn.softmax(s, axis=-1)
    w = jnp.nan_to_num(w, nan=0.0)
    o = jnp.einsum("bhqk,bhkd->bhqd", w, v, precision=_PREC)
    o = o.transpose(0, 2, 1, 3).reshape(B, Sq, H * dh)
    return o @ p["wo"] + p["bo"]


def _ref_ln(x, g, b, eps=_LN_EPS):
    mu = jnp.mean(x, -1, keepdims=True)
    var = jnp.mean((x - mu) ** 2, -1, keepdims=True)
    return (x - mu) / jnp.sqrt(var + eps) * g + b


def _ref_layer(p, x, enc, self_mask, enc_mask):
    x1 = _ref_ln(x + _ref_mha(p["self_attn"], x, x, x, self_mask),
                 p["ln1_g"], p["ln1_b"])
    x2 = _ref_ln(x1 + _ref_mha(p["cross_attn"], x1, enc, enc, enc_mask),
                 p["ln2_g"], p["ln2_b"])
    h = jnp.maximum(x2 @ p["ffn_w1"] + p["ffn_b1"], 0.0)
    f = h @ p["ffn_w2"] + p["ffn_b2"]
    return _ref_ln(x2 + f, p["ln3_g"], p["ln3_b"])


def _ref_decoder(params, x, enc, self_mask, enc_mask):
    out = x
    for p in params:
        out = _ref_layer(p, out, enc, self_mask, enc_mask)
    return out


if __name__ == "__main__":
    B, S_dec, S_enc = 2, 8, 8
    d_model, d_ffn, n_heads, n_layers = 32, 64, 4, 2

    key = jax.random.PRNGKey(0)
    k_params, k_x, k_enc = jax.random.split(key, 3)

    params = init_decoder(k_params, n_layers, d_model, d_ffn, n_heads)
    plans = prepare_decoder_params(params)
    x = jax.random.normal(k_x, (B, S_dec, d_model), jnp.float32)
    enc = jax.random.normal(k_enc, (B, S_enc, d_model), jnp.float32)

    # causal self-attention mask (B, S_dec, S_dec)
    causal = jnp.tril(jnp.ones((S_dec, S_dec), jnp.float32))
    self_mask = jnp.broadcast_to(causal, (B, S_dec, S_dec))
    # encoder padding mask: batch 1 cannot attend to the last 2 encoder positions
    enc_mask = jnp.ones((B, S_dec, S_enc), jnp.float32)
    enc_mask = enc_mask.at[1, :, S_enc - 2:].set(0.0)

    out = standard_decoder_forward(plans, x, enc,
                                   self_attention_mask=self_mask,
                                   encoder_mask=enc_mask)
    out = jax.block_until_ready(out)

    ref = _ref_decoder(params, x, enc, self_mask, enc_mask)
    assert out.shape == (B, S_dec, d_model)
    err = float(jnp.max(jnp.abs(out - ref)))
    assert jnp.allclose(out, ref, atol=1e-4, rtol=1e-4), err

    print("KERNEL_OK")
</pallas_src>

<mosaic_0001>
module attributes {stable_mosaic.version = 11 : i64} {
  func.func @_probe_kernel(%arg0: i32, %arg1: memref<8x128xf32, #tpu.memory_space<vmem>>, %arg2: memref<8x128xf32, #tpu.memory_space<vmem>>, %arg3: memref<8x128xf32, #tpu.memory_space<vmem>>) attributes {dimension_semantics = [#tpu.dimension_semantics<arbitrary>], iteration_bounds = array<i64: 2>, scalar_prefetch = 0 : i64, scratch_operands = 0 : i64, tpu.core_type = #tpu.core_type<tc>, window_params = [{transform_indices = @transform_0, window_bounds = array<i64: 8, 128>}, {pipeline_mode = #tpu.pipeline_mode<synchronous>, transform_indices = @transform_1, window_bounds = array<i64: 8, 128>}, {transform_indices = @transform_2, window_bounds = array<i64: 8, 128>}]} {
    %c0 = arith.constant 0 : index
    %c0_0 = arith.constant 0 : index
    %0 = vector.load %arg1[%c0, %c0_0] : memref<8x128xf32, #tpu.memory_space<vmem>>, vector<8x128xf32>
    %c0_1 = arith.constant 0 : index
    %c0_2 = arith.constant 0 : index
    %1 = vector.load %arg2[%c0_1, %c0_2] : memref<8x128xf32, #tpu.memory_space<vmem>>, vector<8x128xf32>
    %2 = arith.addf %0, %1 : vector<8x128xf32>
    %c0_3 = arith.constant 0 : index
    %c0_4 = arith.constant 0 : index
    %3 = vector.load %arg3[%c0_3, %c0_4] : memref<8x128xf32, #tpu.memory_space<vmem>>, vector<8x128xf32>
    tpu.vector_store %arg3[%c0_3, %c0_4], %2 {strides = array<i32>} : memref<8x128xf32, #tpu.memory_space<vmem>>, vector<8x128xf32>,
    return
  }
  func.func @transform_0(%arg0: i32) -> (i32, i32) {
    %c0_i32 = arith.constant 0 : i32
    %c0_i32_0 = arith.constant 0 : i32
    return %arg0, %c0_i32 : i32, i32
  }
  func.func @transform_1(%arg0: i32) -> (i32, i32) {
    %c0_i32 = arith.constant 0 : i32
    %c0_i32_0 = arith.constant 0 : i32
    %c0_i32_1 = arith.constant 0 : i32
    return %c0_i32, %c0_i32_0 : i32, i32
  }
  func.func @transform_2(%arg0: i32) -> (i32, i32) {
    %c0_i32 = arith.constant 0 : i32
    %c0_i32_0 = arith.constant 0 : i32
    return %arg0, %c0_i32 : i32, i32
  }
}

module attributes {stable_mosaic.version = 11 : i64} {
  func.func @_linear_kernel(%arg0: i32, %arg1: memref<16x32xf32, #tpu.memory_space<vmem>>, %arg2: memref<32x96xf32, #tpu.memory_space<vmem>>, %arg3: memref<1x96xf32, #tpu.memory_space<vmem>>, %arg4: memref<16x96xf32, #tpu.memory_space<vmem>>) attributes {dimension_semantics = [#tpu.dimension_semantics<parallel>], iteration_bounds = array<i64: 1>, scalar_prefetch = 0 : i64, scratch_operands = 0 : i64, tpu.core_type = #tpu.core_type<tc>, window_params = [{transform_indices = @transform_0, window_bounds = array<i64: 16, 32>}, {pipeline_mode = #tpu.pipeline_mode<synchronous>, transform_indices = @transform_1, window_bounds = array<i64: 32, 96>}, {pipeline_mode = #tpu.pipeline_mode<synchronous>, transform_indices = @transform_2, window_bounds = array<i64: 1, 96>}, {transform_indices = @transform_3, window_bounds = array<i64: 16, 96>}]} {
    %c0 = arith.constant 0 : index
    %c0_0 = arith.constant 0 : index
    %0 = vector.load %arg1[%c0, %c0_0] : memref<16x32xf32, #tpu.memory_space<vmem>>, vector<16x32xf32>
    %c0_1 = arith.constant 0 : index
    %c0_2 = arith.constant 0 : index
    %1 = vector.load %arg2[%c0_1, %c0_2] : memref<32x96xf32, #tpu.memory_space<vmem>>, vector<32x96xf32>
    %cst = arith.constant dense<0.000000e+00> : vector<16x96xf32>
    %2 = tpu.matmul %0, %1, %cst {dimension_numbers = #tpu.dot_dimension_numbers<[1], [0], [0], [1], [0, 0, 1, 1], [], []>, precision = #tpu.contract_precision<fp32>} : vector<16x32xf32>, vector<32x96xf32>, vector<16x96xf32> -> vector<16x96xf32>
    %c0_3 = arith.constant 0 : index
    %c0_4 = arith.constant 0 : index
    %3 = vector.load %arg3[%c0_3, %c0_4] : memref<1x96xf32, #tpu.memory_space<vmem>>, vector<1x96xf32>
    %4 = vector.broadcast %3 : vector<1x96xf32> to vector<16x96xf32>
    %5 = arith.addf %2, %4 : vector<16x96xf32>
    %c0_5 = arith.constant 0 : index
    %c0_6 = arith.constant 0 : index
    %6 = vector.load %arg4[%c0_5, %c0_6] : memref<16x96xf32, #tpu.memory_space<vmem>>, vector<16x96xf32>
    tpu.vector_store %arg4[%c0_5, %c0_6], %5 {strides = array<i32>} : memref<16x96xf32, #tpu.memory_space<vmem>>, vector<16x96xf32>,
    return
  }
  func.func @transform_0(%arg0: i32) -> (i32, i32) {
    %c0_i32 = arith.constant 0 : i32
    %c0_i32_0 = arith.constant 0 : i32
    return %arg0, %c0_i32 : i32, i32
  }
  func.func @transform_1(%arg0: i32) -> (i32, i32) {
    %c0_i32 = arith.constant 0 : i32
    %c0_i32_0 = arith.constant 0 : i32
    %c0_i32_1 = arith.constant 0 : i32
    return %c0_i32, %c0_i32_0 : i32, i32
  }
  func.func @transform_2(%arg0: i32) -> (i32, i32) {
    %c0_i32 = arith.constant 0 : i32
    %c0_i32_0 = arith.constant 0 : i32
    %c0_i32_1 = arith.constant 0 : i32
    return %c0_i32, %c0_i32_0 : i32, i32
  }
  func.func @transform_3(%arg0: i32) -> (i32, i32) {
    %c0_i32 = arith.constant 0 : i32
    %c0_i32_0 = arith.constant 0 : i32
    return %arg0, %c0_i32 : i32, i32
  }
}

</mosaic_0001>

<bundles_post_ra>
// kernel: tpu_custom_call.1
= control target key start
LH: loop header
LB: loop body
LE: loop exit
PB: predicated region body
PF: predicated region fallthrough
CT: control target
= control target key end

     0   :  { %7 = vsyncpa [#allocation3], 0  ;;  %s649_s0 = inlined_call_operand.hbm [shape: f32[16,128], index: 0, kind: input, shape index: {}]   ;;  %s650_s1 = inlined_call_operand.hbm [shape: f32[8,128], index: 1, kind: input, shape index: {}]   ;;  %s651_s2 = inlined_call_operand.hbm [shape: f32[16,128], index: 2, kind: output, shape index: {}]  }
   0x1   :  { %9 = vsyncpa [#allocation3 + $0x1], 0 }
   0x2   :  { %10 = vsyncpa [#allocation6], 0 }
   0x3   :  { %11 = vsyncpa [#allocation4], 0 }
   0x4   :  { %13 = vsyncpa [#allocation4 + $0x1], 0  ;;  %s483_s9 = smov 0   ;;  %s485_s10 = smov 0  }
   0x5   :  { %s487_s11 = smov 0   ;;  %s489_s12 = smov 0  }
   0x6 LB: > { %s504_s13 = sadd.s32 4294967295, %s463_s12   ;;  %s270_s14 = sadd.s32 4294967294, %s463_s12   ;;  %s463_s12 = sphi %s489_s12, %s674_s12   ;;  %s459_s11 = sphi %s487_s11, %s673_s11   ;;  %s455_s10 = sphi %s485_s10, %s672_s10   ;;  %s451_s9 = sphi %s483_s9, %s671_s9  }
   0x7   : > { %p39_p0 = scmp.ne.s32.totalorder %s455_s10, %s451_s9  ;;  %p652_p1 = scmp.eq.s32.totalorder %s504_s13, 0 }
   0x8   : > { %p90_p3 = scmp.eq.s32.totalorder %s270_s14, 1  ;;  %p271_p5 = scmp.ge.s32.totalorder %s463_s12, 1 }
   0x9   : > { %p513_p4 = por %p652_p1, %p39_p0  ;;  %p97_p7 = scmp.lt.s32.totalorder %s463_s12, 3 }
   0xa   : > { %p518_p6 = por %p90_p3, %p39_p0  ;;  %s465_s18 = smov [#allocation5]  }
   0xb   : > { %s656_s15 = scalar_select %p513_p4, 1, 0 }
   0xc   : > { %s657_s16 = scalar_select %p518_p6, 1, 0 }
   0xd   : > { %p523_p8 = pnand %p271_p5, %p97_p7  ;;  %s110_s19 = sshll.u32 %s465_s18, 4  ;;  %s111_s19 = int_to_ptr.vmem [resolvable:$true] %s110_s19 }
   0xe   : > { %s531_s20 = sadd.s32 1, %s463_s12   ;;  %s26_s24 = sadd.s32 1, %s459_s11 }
   0xf   : > { %s658_s17 = scalar_select %p523_p8, 1, 0 }
  0x10   : > { %p292_p10 = pneg %p523_p8  ;;  %s23_s22 = ssub.s32 %s463_s12, %s531_s20 }
  0x11   : > { %p541_p12 = scmp.eq.s32.totalorder %s23_s22, 0  ;;  %p33_p13 = scmp.ne.s32.totalorder %s459_s11, %s455_s10 }
  0x12   : > { %p535_p11 = pnand %p292_p10, %p652_p1  ;;  %s352_s25 = scalar_lea.vmem %s111_s19, 128 }
  0x13   : > { %p353_p3 = scmp.ne.s32.totalorder %s111_s19, %s352_s25  ;;  %p360_p9 = scmp.lt.s32.totalorder %s111_s19, %s111_s19 }
  0x14   : > { %p343_p0 = pneg %p535_p11  ;;  %p361_p2 = scmp.lt.s32.totalorder %s352_s25, %s352_s25 }
  0x16   : > { %p355_p5 = pnand %p353_p3, %p343_p0  ;;  %p362_p10 = por %p361_p2, %p360_p9 }
  0x18   : > { %p356_p7 = pneg %p355_p5 }
  0x1a   : > { %p363_p1 = pnand %p362_p10, %p356_p7 }
  0x1c   : > { %366 = shalt.err (!%p363_p1)
}
  0x1d   : > { %295 = dma.hbm_to_vmem [thread:$0]  (!%p535_p11), %s650_s1, 128, %s111_s19, [#allocation6]  }
  0x1e   : > { %s558_s28 = scalar_select %p541_p12, %s459_s11, %s26_s24  }
  0x1f   : > { %p34_p1 = scmp.eq.s32.totalorder %s463_s12, 0  ;;  %p661_p2 = scmp.eq.s32.totalorder %s504_s13, 1 }
  0x20   : > { %p305_p0 = scmp.lt.s32.totalorder %s463_s12, 2  ;;  %s121_s30 = sand.u32 1, %s459_s11  }
  0x21   : > { %p566_p9 = por %p661_p2, %p33_p13  ;;  %p35_p3 = por %p34_p1, %p33_p13 }
  0x22   : > { %s274_s3 = sshll.u32 %s121_s30, 3  ;;  %s275_s4 = sshll.u32 %s463_s12, 7 }
  0x23   : > { %s662_s29 = scalar_select %p566_p9, 1, 0 }
  0x24   : > { %s579_s7 = scalar_lea.hbm %s649_s0, %s275_s4  ;;  %s125_s8 = scalar_lea.vmem [#allocation2], %s274_s3 }
  0x25   : > { %s132_s14 = sshll.u32 %s125_s8, 4  ;;  %p581_p11 = pnand %p305_p0, %p35_p3  ;;  %s133_s14 = int_to_ptr.vmem [resolvable:$true] %s132_s14 }
  0x26   : > { %s122_s19 = scalar_lea.sflag [#allocation3], %s121_s30  ;;  %s367_s21 = scalar_lea.hbm %s579_s7, 128 }
  0x27   : > { %p368_p12 = scmp.ne.s32.totalorder %s579_s7, %s367_s21  ;;  %p369_p13 = pneg %p581_p11 }
  0x28   : > { %s372_s24 = scalar_lea.hbm %s649_s0, 256  ;;  %p373_p10 = scmp.lt.s32.totalorder %s579_s7, %s649_s0 }
  0x29   : > { %p370_p5 = pnand %p369_p13, %p368_p12  ;;  %p374_p1 = scmp.lt.s32.totalorder %s372_s24, %s367_s21 }
  0x2b   : > { %p371_p7 = pneg %p370_p5  ;;  %p375_p2 = por %p374_p1, %p373_p10 }
  0x2d   : > { %p376_p0 = pnand %p375_p2, %p371_p7 }
  0x2f   : > { %379 = shalt.err (!%p376_p0)
}
  0x30   : > { %s380_s27 = scalar_lea.vmem %s133_s14, 128  ;;  %s466_s30 = smov [#allocation2]  }
  0x31   : > { %p381_p3 = scmp.ne.s32.totalorder %s133_s14, %s380_s27  ;;  %s385_s3 = sshll.u32 %s466_s30, 4  ;;  %s386_s3 = int_to_ptr.vmem [resolvable:$false] %s385_s3 }
  0x32   : > { %s387_s4 = scalar_lea.vmem %s386_s3, 256  ;;  %p388_p12 = scmp.lt.s32.totalorder %s133_s14, %s386_s3 }
  0x33   : > { %p383_p6 = pnand %p381_p3, %p369_p13  ;;  %p389_p5 = scmp.lt.s32.totalorder %s387_s4, %s380_s27 }
  0x35   : > { %p384_p9 = pneg %p383_p6  ;;  %p390_p4 = por %p389_p5, %p388_p12 }
  0x37   : > { %p391_p8 = pnand %p390_p4, %p384_p9 }
  0x39   : > { %394 = shalt.err (!%p391_p8)
}
  0x3a   : > { %299 = dma.hbm_to_vmem [thread:$0]  (!%p581_p11), %s579_s7, 128, %s133_s14, %s122_s19  }
  0x3b   : > { %p664_p7 = scmp.ne.s32.totalorder %s658_s17, 0 }
  0x3c   : > { %s602_s5 = sand.u32 (!%p664_p7), 1, %s455_s10   ;;  %p665_p6 = scmp.ne.s32.totalorder (!%p664_p7), %s656_s15, 0 }
  0x3d   : > { %141 = sbr.rel (%p664_p7) target bundleno = 95 (0x5f), region = 28  ;;  %s277_s6 = sshll.u32 (!%p664_p7), %s602_s5, 3 }
  0x3e   : > { %s144_s8 = scalar_lea.sflag (!%p664_p7), [#allocation3], %s602_s5  ;;  %s147_s21 = scalar_lea.vmem (!%p664_p7), [#allocation2], %s277_s6 }
  0x42   : > { %438 = dma.done.wait (%p665_p6), %s144_s8, 128  }
  0x43   : > { %440 = vsyncadd (%p665_p6), %s144_s8, 4294967168  ;;  %p666_p4 = scmp.eq.s32.totalorder %s504_s13, 0 }
  0x45   : > { %442 = dma.done.wait (%p666_p4), [#allocation6], 128   ;;  %p667_p8 = pmov %p666_p4 }
  0x46   : > { %s171_s17 = scalar_lea.vmem [#allocation7], %s277_s6  ;;  %s281_s14 = sshll.u32 %s504_s13, 7  ;;  %v172_v0 = vld [vmem:[%s147_s21] sm:$0xff]  ;;  %v173_v1 = vld [vmem:[#allocation5] sm:$0xff] }
  0x47   : > { %444 = vsyncadd (%p667_p8), [#allocation6], 4294967168  ;;  %s190_s7 = sshll.u32 %s171_s17, 4  ;;  %v174_v2 = vadd.f32 %v173_v1, %v172_v0  ;;  %s188_s15 = scalar_lea.hbm %s651_s2, %s281_s14  ;;  %s191_s7 = int_to_ptr.vmem [resolvable:$true] %s190_s7 }
  0x48   : > { %s177_s22 = scalar_lea.sflag [#allocation4], %s602_s5  ;;  %s395_s23 = scalar_lea.vmem %s191_s7, 128 }
  0x49   : > { %175 = vst [vmem:[%s171_s17] sm:$0xff] %v174_v2  ;;  %p396_p9 = scmp.ne.s32.totalorder %s191_s7, %s395_s23  ;;  %p668_p11 = scmp.ne.s32.totalorder %s662_s29, 0 }
  0x4a   : > { %s467_s24 = smov [#allocation7]  }
  0x4b   : > { %p397_p13 = pnand %p396_p9, %p668_p11  ;;  %s399_s25 = sshll.u32 %s467_s24, 4  ;;  %s400_s25 = int_to_ptr.vmem [resolvable:$false] %s399_s25 }
  0x4c   : > { %s401_s26 = scalar_lea.vmem %s400_s25, 256  ;;  %p402_p1 = scmp.lt.s32.totalorder %s191_s7, %s400_s25 }
  0x4d   : > { %p398_p10 = pneg %p397_p13  ;;  %p403_p2 = scmp.lt.s32.totalorder %s401_s26, %s395_s23 }
  0x4f   : > { %p404_p0 = por %p403_p2, %p402_p1 }
  0x51   : > { %p405_p3 = pnand %p404_p0, %p398_p10 }
  0x53   : > { %408 = shalt.err (!%p405_p3)
}
  0x54   : > { %s409_s13 = scalar_lea.hbm %s188_s15, 128  ;;  %s413_s3 = scalar_lea.hbm %s651_s2, 256 }
  0x55   : > { %p410_p12 = scmp.ne.s32.totalorder %s188_s15, %s409_s13  ;;  %p414_p6 = scmp.lt.s32.totalorder %s188_s15, %s651_s2 }
  0x56   : > { %p415_p4 = scmp.lt.s32.totalorder %s413_s3, %s409_s13 }
  0x57   : > { %p411_p5 = pnand %p410_p12, %p668_p11 }
  0x58   : > { %p416_p8 = por %p415_p4, %p414_p6 }
  0x59   : > { %p412_p7 = pneg %p411_p5 }
  0x5b   : > { %p417_p9 = pnand %p416_p8, %p412_p7 }
  0x5d   : > { %420 = shalt.err (!%p417_p9)
}
  0x5e   : > { %290 = dma.vmem_to_hbm [thread:$0]  (%p668_p11), %s191_s7, 128, %s188_s15, %s177_s22  }
  0x5f PF: > { %s202_s6 = sand.u32 1, %s451_s9   ;;  %p669_p13 = scmp.ne.s32.totalorder %s657_s16, 0 }
  0x60   : > { %p670_p10 = scmp.ge.s32.totalorder %s463_s12, 2  ;;  %s203_s8 = scalar_lea.sflag [#allocation4], %s202_s6 }
  0x62   : > { %p301_p1 = pnand %p670_p10, %p669_p13 }
  0x64   : > { %p302_p2 = pneg %p301_p1 }
  0x66   : > { %446 = dma.done.wait (%p302_p2), %s203_s8, 128  }
  0x67   : > { %448 = vsyncadd (%p302_p2), %s203_s8, 4294967168  ;;  %p16_p0 = scmp.ge.s32.totalorder %s531_s20, 4   ;;  %s671_s9 = smov %s455_s10 }
  0x68   : > { %s672_s10 = smov %s459_s11  ;;  %s673_s11 = smov %s558_s28 }
  0x69   : > { %s674_s12 = smov %s531_s20  ;;  %18 = sbr.rel (!%p16_p0) target bundleno = 6 (0x6), region = 77 }
  0x6e   :  { %208 = vsyncpa [#allocation3], 1 }
  0x6f   :  { %210 = vsyncpa [#allocation3 + $0x1], 1 }
  0x70   :  { %211 = vsyncpa [#allocation6], 1 }
  0x71   :  { %212 = vsyncpa [#allocation4], 1 }
  0x72   :  { %214 = vsyncpa [#allocation4 + $0x1], 1 }

// kernel: tpu_custom_call.1
= control target key start
LH: loop header
LB: loop body
LE: loop exit
PB: predicated region body
PF: predicated region fallthrough
CT: control target
= control target key end

     0   :  { %8 = vsyncpa [#allocation3], 0  ;;  %s880_s0 = inlined_call_operand.hbm [shape: f32[16,32], index: 0, kind: input, shape index: {}]   ;;  %s881_s1 = inlined_call_operand.hbm [shape: f32[32,96], index: 1, kind: input, shape index: {}]   ;;  %s882_s2 = inlined_call_operand.vmem [shape: f32[1,96], index: 2, kind: input, shape index: {}]   ;;  %s883_s3 = inlined_call_operand.hbm [shape: f32[16,96], index: 3, kind: output, shape index: {}]  }
   0x1   :  { %9 = vsyncpa [#allocation6], 0 }
   0x2   :  { %10 = vsyncpa [#allocation4], 0  ;;  %s786_s12 = smov [#allocation2]  }
   0x3   :  { %s16_s13 = sshll.u32 %s786_s12, 4  ;;  %s17_s13 = int_to_ptr.vmem [resolvable:$true] %s16_s13 }
   0x4   :  { %s728_s14 = scalar_lea.vmem %s17_s13, 256  ;;  %p733_p1 = scmp.lt.s32.totalorder %s17_s13, %s17_s13 }
   0x5   :  { %p729_p0 = scmp.ne.s32.totalorder %s17_s13, %s728_s14  ;;  %p734_p2 = scmp.lt.s32.totalorder %s728_s14, %s728_s14 }
   0x7   :  { %p735_p3 = por %p734_p2, %p733_p1 }
   0x9   :  { %p736_p4 = pnand %p735_p3, %p729_p0 }
   0xb   :  { %739 = shalt.err (!%p736_p4)
}
   0xc   :  { %s787_s15 = smov 128   ;;  %s788_s16 = smov 8  }
   0xd   :  { %22 = dma.hbm_to_vmem [thread:$0]  %s880_s0, 256, %s17_s13, [#allocation3], %s787_s15, %s787_s15, %s788_s16  }
   0xe   :  { %s789_s19 = smov [#allocation5]  }
   0xf   :  { %s28_s20 = sshll.u32 %s789_s19, 4  ;;  %s29_s20 = int_to_ptr.vmem [resolvable:$true] %s28_s20 }
  0x10   :  { %s748_s21 = scalar_lea.vmem %s29_s20, 512  ;;  %p753_p6 = scmp.lt.s32.totalorder %s29_s20, %s29_s20 }
  0x11   :  { %p749_p5 = scmp.ne.s32.totalorder %s29_s20, %s748_s21  ;;  %p754_p7 = scmp.lt.s32.totalorder %s748_s21, %s748_s21 }
  0x13   :  { %p755_p8 = por %p754_p7, %p753_p6 }
  0x15   :  { %p756_p9 = pnand %p755_p8, %p749_p5 }
  0x17   :  { %759 = shalt.err (!%p756_p9)
}
  0x18   :  { %34 = dma.hbm_to_vmem [thread:$0]  %s881_s1, 512, %s29_s20, [#allocation6], %s787_s15, %s787_s15, %s788_s16  }
  0x19   :  { %780 = dma.done.wait [#allocation3], 256  }
  0x1a   :  { %781 = vsyncadd [#allocation3], 4294967040 }
  0x1b   :  { %782 = dma.done.wait [#allocation6], 512  }
  0x1c   :  { %783 = vsyncadd [#allocation6], 4294966784  ;;  %vm56_vm0 = vcmask 261120   ;;  %v48_v0 = vld [vmem:[#allocation5 + $0x18] sm:$0xff]  ;;  %v47_v1 = vld [vmem:[#allocation5 + $0x10] sm:$0xff]  ;;  %vm591_vm1 = vcmask 785408  }
  0x1d   :  { %v46_v2 = vld [vmem:[#allocation5 + $0x8] sm:$0xff]  ;;  %v823_v3 = vand.u32 4294901760, %v48_v0  ;;  %v825_v4 = vand.u32 4294901760, %v47_v1  ;;  %v45_v6 = vld [vmem:[#allocation5] sm:$0xff]  ;;  %v43_v7 = vld [vmem:[#allocation2] sm:$0xff] }
  0x1e   :  { %v827_v5 = vand.u32 4294901760, %v46_v2  ;;  %v44_v8 = vld [vmem:[#allocation2 + $0x8] sm:$0xff]  ;;  %v829_v9 = vand.u32 4294901760, %v45_v6  ;;  %v58_v10 = vsel %vm56_vm0, %v43_v7, 0  ;;  %v612_v39 = vld [vmem:[%s882_s2] ss:$0 sm:$0xff] }
  0x1f   :  { %v61_v11 = vsel %vm56_vm0, %v44_v8, 0  ;;  %649 = vmatprep.subr.mxu0 %v823_v3  ;;  %v178_v12 = vsub.f32 %v48_v0, %v823_v3  ;;  %v833_v13 = vand.u32 4294901760, %v58_v10  ;;  %v185_v15 = vsub.f32 %v47_v1, %v825_v4  ;;  %s790_s2 = smov [#allocation7]  }
  0x20   :  { %v835_v14 = vand.u32 4294901760, %v61_v11  ;;  %650 = vmatpush3.msra.mxu0 %v823_v3  ;;  %v192_v16 = vsub.f32 %v46_v2, %v827_v5  ;;  %v199_v17 = vsub.f32 %v45_v6, %v829_v9  ;;  %s599_s24 = sshll.u32 %s790_s2, 4  ;;  %s600_s24 = int_to_ptr.vmem [resolvable:$true] %s599_s24 }
  0x21   :  { %651 = vmatprep.subr.mxu0 %v825_v4  ;;  %v179_v18 = vand.u32 4294901760, %v178_v12  ;;  %v133_v19 = vsub.f32 %v58_v10, %v833_v13  ;;  %v186_v20 = vand.u32 4294901760, %v185_v15  ;;  %668 = vmatprep.mubr.f32.mxu1 %v833_v13  ;;  %s760_s25 = scalar_lea.vmem %s600_s24, 256  ;;  %p765_p11 = scmp.lt.s32.totalorder %s600_s24, %s600_s24 }
  0x22   :  { %v143_v21 = vsub.f32 %v61_v11, %v835_v14  ;;  %652 = vmatpush3.msra.mxu0 %v825_v4  ;;  %v193_v22 = vand.u32 4294901760, %v192_v16  ;;  %v200_v23 = vand.u32 4294901760, %v199_v17  ;;  %p761_p10 = scmp.ne.s32.totalorder %s600_s24, %s760_s25  ;;  %p766_p12 = scmp.lt.s32.totalorder %s760_s25, %s760_s25 }
  0x23   :  { %653 = vmatprep.subr.mxu0 %v827_v5  ;;  %v180_v24 = vsub.f32 %v178_v12, %v179_v18  ;;  %v134_v25 = vand.u32 4294901760, %v133_v19  ;;  %v187_v26 = vsub.f32 %v185_v15, %v186_v20 }
  0x24   :  { %v144_v27 = vand.u32 4294901760, %v143_v21  ;;  %654 = vmatpush3.msra.mxu0 %v827_v5  ;;  %v194_v28 = vsub.f32 %v192_v16, %v193_v22  ;;  %v201_v29 = vsub.f32 %v199_v17, %v200_v23  ;;  %p767_p13 = por %p766_p12, %p765_p11 }
  0x25   :  { %655 = vmatprep.subr.mxu0 %v829_v9  ;;  %v181_v30 = vand.u32 4294901760, %v180_v24  ;;  %v135_v31 = vsub.f32 %v133_v19, %v134_v25  ;;  %v188_v32 = vand.u32 4294901760, %v187_v26 }
  0x26   :  { %v145_v33 = vsub.f32 %v143_v21, %v144_v27  ;;  %656 = vmatpush3.msra.mxu0 %v829_v9  ;;  %v195_v36 = vand.u32 4294901760, %v194_v28  ;;  %v202_v37 = vand.u32 4294901760, %v201_v29  ;;  %p768_p0 = pnand %p767_p13, %p761_p10 }
  0x27   :  { %660 = vmatprep.subr.mxu1 %v181_v30  ;;  %v136_v34 = vand.u32 4294901760, %v135_v31  ;;  %671 = vmatprep.subr.mxu0 %v178_v12 }
  0x28   :  { %v146_v35 = vand.u32 4294901760, %v145_v33  ;;  %661 = vmatpush3.msra.mxu1 %v181_v30 }
  0x29   :  { %657 = vmatprep.mubr.f32.mxu0 %v136_v34  ;;  %662 = vmatprep.subr.mxu1 %v188_v32 }
  0x2a   :  { %658 = vmatmul.mubr.f32.vlgmr.msra.gmra.mxu0 %v146_v35  ;;  %663 = vmatpush3.msra.mxu1 %v188_v32 }
  0x2b   :  { %672 = vmatpush3.msra.mxu0 %v178_v12  ;;  %664 = vmatprep.subr.mxu1 %v195_v36 }
  0x2c   :  { %673 = vmatprep.subr.mxu0 %v185_v15  ;;  %665 = vmatpush3.msra.mxu1 %v195_v36 }
  0x2d   :  { %674 = vmatpush3.msra.mxu0 %v185_v15  ;;  %666 = vmatprep.subr.mxu1 %v202_v37 }
  0x2e   :  { %675 = vmatprep.subr.mxu0 %v192_v16  ;;  %667 = vmatpush3.msra.mxu1 %v202_v37 }
  0x2f   :  { %676 = vmatpush3.msra.mxu0 %v192_v16  ;;  %669 = vmatmul.mubr.f32.vlgmr.msra.gmra.mxu1 %v835_v14 }
  0x30   :  { %677 = vmatprep.subr.mxu0 %v199_v17  ;;  %682 = vmatprep.subr.mxu1 %v823_v3 }
  0x31   :  { %678 = vmatpush3.msra.mxu0 %v199_v17  ;;  %679 = vmatprep.mubr.f32.mxu0 %v133_v19 }
  0x32   :  { %683 = vmatpush3.msra.mxu1 %v823_v3  ;;  %680 = vmatmul.mubr.f32.vlgmr.msra.gmra.mxu0 %v143_v21 }
  0x33   :  { %684 = vmatprep.subr.mxu1 %v825_v4  ;;  %693 = vmatprep.subr.mxu0 %v179_v18 }
  0x34   :  { %685 = vmatpush3.msra.mxu1 %v825_v4  ;;  %694 = vmatpush3.msra.mxu0 %v179_v18 }
  0x35   :  { %686 = vmatprep.subr.mxu1 %v827_v5  ;;  %695 = vmatprep.subr.mxu0 %v186_v20 }
  0x36   :  { %687 = vmatpush3.msra.mxu1 %v827_v5  ;;  %696 = vmatpush3.msra.mxu0 %v186_v20 }
  0x37   :  { %688 = vmatprep.subr.mxu1 %v829_v9  ;;  %697 = vmatprep.subr.mxu0 %v193_v22 }
  0x38   :  { %689 = vmatpush3.msra.mxu1 %v829_v9  ;;  %690 = vmatprep.mubr.f32.mxu1 %v134_v25 }
  0x39   :  { %698 = vmatpush3.msra.mxu0 %v193_v22  ;;  %691 = vmatmul.mubr.f32.vlgmr.msra.gmra.mxu1 %v144_v27 }
  0x3a   :  { %699 = vmatprep.subr.mxu0 %v200_v23  ;;  %704 = vmatprep.subr.mxu1 %v823_v3 }
  0x3b   :  { %700 = vmatpush3.msra.mxu0 %v200_v23  ;;  %701 = vmatprep.mubr.f32.mxu0 %v833_v13 }
  0x3c   :  { %705 = vmatpush3.msra.mxu1 %v823_v3  ;;  %702 = vmatmul.mubr.f32.vlgmr.msra.gmra.mxu0 %v835_v14 }
  0x3d   :  { %706 = vmatprep.subr.mxu1 %v825_v4  ;;  %712 = vmatprep.mubr.f32.mxu1 %v833_v13 }
  0x3e   :  { %707 = vmatpush3.msra.mxu1 %v825_v4 }
  0x3f   :  { %708 = vmatprep.subr.mxu1 %v827_v5 }
  0x40   :  { %709 = vmatpush3.msra.mxu1 %v827_v5 }
  0x41   :  { %710 = vmatprep.subr.mxu1 %v829_v9 }
  0x42   :  { %711 = vmatpush3.msra.mxu1 %v829_v9 }
  0x43   :  { %713 = vmatmul.mubr.f32.vlgmr.msra.gmra.mxu1 %v835_v14 }
  0xea   :  { %v659_v38 = vpop.f32.mrf.mxu0 }
  0xeb   :  { %v149_v42 = vadd.f32 %v659_v38, %v612_v39 }
  0xec   :  { %v138_v40 = vpop.f32.mrf.mxu0 }
  0xed   :  { %v139_v43 = vadd.f32 %v612_v39, %v138_v40 }
  0xef   :  { %v670_v41 = vpop.f32.mrf.mxu1 }
  0xf0   :  { %v246_v46 = vadd.f32 %v670_v41, %v149_v42 }
  0xf1   :  { %v239_v44 = vpop.f32.mrf.mxu1 }
  0xf2   :  { %v681_v45 = vpop.f32.mrf.mxu0  ;;  %v240_v48 = vadd.f32 %v239_v44, %v139_v43 }
  0xf3   :  { %v333_v50 = vadd.f32 %v681_v45, %v246_v46 }
  0xf4   :  { %v325_v49 = vpop.f32.mrf.mxu0 }
  0xf5   :  { %v326_v53 = vadd.f32 %v325_v49, %v240_v48 }
  0xf9   :  { %v692_v47 = vpop.f32.mrf.mxu1 }
  0xfa   :  { %v418_v54 = vadd.f32 %v692_v47, %v333_v50 }
  0xfb   :  { %v409_v51 = vpop.f32.mrf.mxu1 }
  0xfc   :  { %v703_v52 = vpop.f32.mrf.mxu0  ;;  %v410_v55 = vadd.f32 %v409_v51, %v326_v53 }
  0xfd   :  { %v507_v57 = vadd.f32 %v703_v52, %v418_v54 }
  0xfe   :  { %v500_v56 = vpop.f32.mrf.mxu0 }
  0xff   :  { %v501_v59 = vadd.f32 %v500_v56, %v410_v55 }
 0x103   :  { %v714_v58 = vpop.f32.mrf.mxu1 }
 0x104   :  { %v588_v60 = vadd.f32 %v714_v58, %v507_v57 }
 0x105   :  { %v581_v61 = vpop.f32.mrf.mxu1 }
 0x106   :  { %v582_v62 = vadd.f32 %v581_v61, %v501_v59  ;;  %593 = vst.msk [vmem:[#allocation7 + $0x8] sm:$0xff] %vm591_vm1, %v588_v60 }
 0x108   :  { %592 = vst.msk [vmem:[#allocation7] sm:$0xff] %vm591_vm1, %v582_v62 }
 0x109   :  { %771 = shalt.err (!%p768_p0)
}
 0x10a   :  { %605 = dma.vmem_to_hbm [thread:$0]  %s600_s24, 256, %s883_s3, [#allocation4], %s787_s15, %s787_s15, %s788_s16  }
 0x10b   :  { %784 = dma.done.wait [#allocation4], 256  }
 0x10c   :  { %785 = vsyncadd [#allocation4], 4294967040 }
 0x10d   :  { %609 = vsyncpa [#allocation3], 1 }
 0x10e   :  { %610 = vsyncpa [#allocation6], 1 }
 0x10f   :  { %611 = vsyncpa [#allocation4], 1 }

</bundles_post_ra>
